<compile_context>
chip_gen: v5e
topology: v5e:2x2
jax: 0.10.0
libtpu: 0.0.40
codegen_flags: <defaults>
</compile_context>

<pallas_src>
import jax
import jax.numpy as jnp
from jax.experimental import pallas as pl
from jax.experimental.pallas import tpu as pltpu

BN_EPS = 1e-5
CONV_DTYPE = jnp.bfloat16   # MXU operand dtype; accumulation and all BN math stay f32.


# ---------------------------------------------------------------------------
# Fused Pallas kernel
# ---------------------------------------------------------------------------
def block_a_kernel(x_ref, b1_ref, b2_ref, p_ref,
                   g1_ref, be1_ref, g2_ref, be2_ref,
                   o_ref, xp_ref):
    """Fused BlockA forward (single invocation, everything resident in VMEM).

    x_ref  : (N, H, W*C)   f32   input, lane-dense NHWC ("(w c)" packed into lanes)
    b*_ref : (3, W*C, W*C) bf16  banded conv weights, one matrix per kernel row dy
    p_ref  : (W*C, W*C)    f32   channel-sum/broadcast matrix, pre-scaled by 1/(N*H*W)
    g*/be* : (1, W*C)      f32   BN gamma/beta tiled per lane
    o_ref  : (N*H, W*C)    f32   output slab (row = (n, h), lane = w*C + c)
    xp_ref : (N, H+2, W*C) bf16  row-padded activation scratch (zero halo rows)
    """
    N, Hp2, WC = xp_ref.shape
    H = Hp2 - 2
    NH = N * H

    # Zero only the halo rows; the interior is rewritten before each conv.
    zrow = jnp.zeros((N, 1, WC), xp_ref.dtype)
    xp_ref[:, 0:1, :] = zrow
    xp_ref[:, H + 1:H + 2, :] = zrow

    def conv3x3(b_ref):
        # One full-lane-width matmul per kernel row; the dx taps and the zero padding
        # along W live inside the banded (W*C, W*C) weight matrices.
        y = None
        for dy in range(3):
            tap = xp_ref[:, dy:dy + H, :].reshape(NH, WC)          # bf16, (NH, WC)
            t = jnp.dot(tap, b_ref[dy], preferred_element_type=jnp.float32)
            y = t if y is None else y + t
        return y                                                    # (NH, WC) f32

    def bn(y, g_ref, be_ref):
        # Training-mode BatchNorm2d (biased variance over the batch), folded into a
        # single FMA.  p_ref reduces per-lane sums to per-channel values and
        # broadcasts them back to all W*C lanes in one tiny matmul.
        s = jnp.sum(y, axis=0, keepdims=True)                       # (1, WC)
        q = jnp.sum(y * y, axis=0, keepdims=True)                   # (1, WC)
        mean = jnp.dot(s, p_ref[...], preferred_element_type=jnp.float32)
        ex2 = jnp.dot(q, p_ref[...], preferred_element_type=jnp.float32)
        var = ex2 - mean * mean
        scale = g_ref[...] * jax.lax.rsqrt(var + BN_EPS)            # (1, WC)
        shift = be_ref[...] - mean * scale
        return y * scale + shift

    # conv1 -> BN1 -> ReLU
    xp_ref[:, 1:H + 1, :] = x_ref[...].astype(xp_ref.dtype)
    z1 = jnp.maximum(bn(conv3x3(b1_ref), g1_ref, be1_ref), 0.0)

    # conv2 -> BN2 -> +identity -> ReLU   (x_ref is re-read here, not kept live)
    xp_ref[:, 1:H + 1, :] = z1.reshape(N, H, WC).astype(xp_ref.dtype)
    z2 = bn(conv3x3(b2_ref), g2_ref, be2_ref) + x_ref[...].reshape(NH, WC)
    o_ref[...] = jnp.maximum(z2, 0.0).astype(o_ref.dtype)


# ---------------------------------------------------------------------------
# Wrapper: weight banding, BN param tiling, layout glue
# ---------------------------------------------------------------------------
def _banded_conv_weights(w_hwio, W):
    """(3, 3, Cin, Cout) HWIO -> (3, W*Cin, W*Cout) banded matrices (one per dy).

    B[dy, win*Cin+ci, wout*Cout+co] = w[dy, win-wout+1, ci, co] when |win-wout| <= 1,
    zero otherwise; missing taps at wout = 0 / W-1 implement the conv's zero padding.
    """
    KH, KW, Cin, Cout = w_hwio.shape
    dx = jnp.arange(W)[:, None] - jnp.arange(W)[None, :] + 1        # (Win, Wout)
    valid = (dx >= 0) & (dx < KW)
    b = w_hwio[:, jnp.clip(dx, 0, KW - 1)]                          # (KH, Win, Wout, Cin, Cout)
    b = jnp.where(valid[None, :, :, None, None], b, 0.0)
    b = jnp.transpose(b, (0, 1, 3, 2, 4)).reshape(KH, W * Cin, W * Cout)
    return b.astype(CONV_DTYPE)


def _channel_sum_matrix(W, C, count):
    """(W*C, W*C) matrix: (row-sums) @ P = per-channel mean broadcast to all lanes."""
    lane_c = jnp.arange(W * C) % C
    return (lane_c[:, None] == lane_c[None, :]).astype(jnp.float32) / float(count)


@jax.jit
def block_a_forward(x_nchw, params):
    """BlockA forward; semantics of the PyTorch module (train-mode BN).  x: (N,C,H,W) f32."""
    N, C, H, W = x_nchw.shape
    WC = W * C
    # NCHW -> lane-dense (N, H, W*C).  TODO(synk): at network scale keep activations
    # NHWC end-to-end so this transpose glue (a full HBM round trip) disappears.
    x_lane = jnp.transpose(x_nchw, (0, 2, 3, 1)).reshape(N, H, WC)

    b1 = _banded_conv_weights(params["w1"], W)
    b2 = _banded_conv_weights(params["w2"], W)
    p = _channel_sum_matrix(W, C, N * H * W)
    tile = lambda v: jnp.tile(v.reshape(1, C).astype(jnp.float32), (1, W))
    g1, be1 = tile(params["gamma1"]), tile(params["beta1"])
    g2, be2 = tile(params["gamma2"]), tile(params["beta2"])

    out2d = pl.pallas_call(
        block_a_kernel,
        out_shape=jax.ShapeDtypeStruct((N * H, WC), jnp.float32),
        in_specs=[
            pl.BlockSpec((N, H, WC), lambda: (0, 0, 0)),
            pl.BlockSpec((3, WC, WC), lambda: (0, 0, 0)),
            pl.BlockSpec((3, WC, WC), lambda: (0, 0, 0)),
            pl.BlockSpec((WC, WC), lambda: (0, 0)),
            pl.BlockSpec((1, WC), lambda: (0, 0)),
            pl.BlockSpec((1, WC), lambda: (0, 0)),
            pl.BlockSpec((1, WC), lambda: (0, 0)),
            pl.BlockSpec((1, WC), lambda: (0, 0)),
        ],
        out_specs=pl.BlockSpec((N * H, WC), lambda: (0, 0)),
        scratch_shapes=[pltpu.VMEM((N, H + 2, WC), CONV_DTYPE)],    # row-padded scratch
        compiler_params=pltpu.CompilerParams(vmem_limit_bytes=32 * 1024 * 1024),
    )(x_lane, b1, b2, p, g1, be1, g2, be2)

    return jnp.transpose(out2d.reshape(N, H, W, C), (0, 3, 1, 2))   # lane-dense -> NCHW


# ---------------------------------------------------------------------------
# Pure-JAX reference with the SAME numerics policy (bf16 conv operands, f32 rest)
# ---------------------------------------------------------------------------
def _ref_forward(x_nchw, params):
    x = jnp.transpose(x_nchw, (0, 2, 3, 1))
    identity = x

    def conv(v, w):
        return jax.lax.conv_general_dilated(
            v.astype(CONV_DTYPE), w.astype(CONV_DTYPE),
            window_strides=(1, 1), padding=((1, 1), (1, 1)),
            dimension_numbers=("NHWC", "HWIO", "NHWC"),
            preferred_element_type=jnp.float32)

    def bn(v, g, b):
        mean = jnp.mean(v, axis=(0, 1, 2), keepdims=True)
        var = jnp.mean((v - mean) ** 2, axis=(0, 1, 2), keepdims=True)
        return (v - mean) * jax.lax.rsqrt(var + BN_EPS) * g.reshape(1, 1, 1, -1) \
            + b.reshape(1, 1, 1, -1)

    out = jnp.maximum(bn(conv(x, params["w1"]), params["gamma1"], params["beta1"]), 0.0)
    out = bn(conv(out, params["w2"]), params["gamma2"], params["beta2"]) + identity
    return jnp.transpose(jnp.maximum(out, 0.0), (0, 3, 1, 2))


# ---------------------------------------------------------------------------
if __name__ == "__main__":
    # Residual add requires in_planes == out_planes; W*C = 128 -> lane-dense slabs.
    N, C, H, W = 2, 8, 16, 16

    key = jax.random.PRNGKey(0)
    kx, kw1, kw2, kg1, kb1, kg2, kb2 = jax.random.split(key, 7)

    x = jax.random.normal(kx, (N, C, H, W), dtype=jnp.float32)
    params = {
        # conv weights stored HWIO: (ky, kx, Cin, Cout); deterministic synthetic init.
        "w1": jax.random.normal(kw1, (3, 3, C, C), dtype=jnp.float32) * 0.1,
        "w2": jax.random.normal(kw2, (3, 3, C, C), dtype=jnp.float32) * 0.1,
        # BatchNorm affine params (PyTorch default would be ones/zeros; random here).
        "gamma1": 1.0 + 0.1 * jax.random.normal(kg1, (C,), dtype=jnp.float32),
        "beta1": 0.1 * jax.random.normal(kb1, (C,), dtype=jnp.float32),
        "gamma2": 1.0 + 0.1 * jax.random.normal(kg2, (C,), dtype=jnp.float32),
        "beta2": 0.1 * jax.random.normal(kb2, (C,), dtype=jnp.float32),
    }

    out = jax.block_until_ready(block_a_forward(x, params))
    ref = jax.block_until_ready(_ref_forward(x, params))

    assert out.shape == (N, C, H, W), out.shape
    err = float(jnp.max(jnp.abs(out - ref)))
    # Both sides use bf16 conv operands with f32 accumulation, so the remaining error
    # is accumulation-order / rounding-boundary only; 1e-2 is the bf16-variant bound
    # (use ~1e-4 if CONV_DTYPE is flipped back to f32).
    assert err < 1e-2, err
    print("KERNEL_OK")
</pallas_src>

<mosaic_0001>
module attributes {stable_mosaic.version = 11 : i64} {
  func.func @block_a_kernel(%arg0: memref<2x16x128xf32, #tpu.memory_space<vmem>>, %arg1: memref<3x128x128xbf16, #tpu.memory_space<vmem>>, %arg2: memref<3x128x128xbf16, #tpu.memory_space<vmem>>, %arg3: memref<128x128xf32, #tpu.memory_space<vmem>>, %arg4: memref<1x128xf32, #tpu.memory_space<vmem>>, %arg5: memref<1x128xf32, #tpu.memory_space<vmem>>, %arg6: memref<1x128xf32, #tpu.memory_space<vmem>>, %arg7: memref<1x128xf32, #tpu.memory_space<vmem>>, %arg8: memref<32x128xf32, #tpu.memory_space<vmem>>, %arg9: memref<2x18x128xbf16, #tpu.memory_space<vmem>>) attributes {dimension_semantics = [], scalar_prefetch = 0 : i64, scratch_operands = 1 : i64, tpu.core_type = #tpu.core_type<tc>} {
    %cst = arith.constant 0.000000e+00 : bf16
    %0 = vector.broadcast %cst : bf16 to vector<2x1x128xbf16>
    %c0 = arith.constant 0 : index
    %c0_0 = arith.constant 0 : index
    %c0_1 = arith.constant 0 : index
    %1 = vector.load %arg9[%c0, %c0_0, %c0_1] : memref<2x18x128xbf16, #tpu.memory_space<vmem>>, vector<2x1x128xbf16>
    tpu.vector_store %arg9[%c0, %c0_0, %c0_1], %0 {strides = array<i32>} : memref<2x18x128xbf16, #tpu.memory_space<vmem>>, vector<2x1x128xbf16>,
    %c0_2 = arith.constant 0 : index
    %c17 = arith.constant 17 : index
    %c0_3 = arith.constant 0 : index
    %2 = vector.load %arg9[%c0_2, %c17, %c0_3] : memref<2x18x128xbf16, #tpu.memory_space<vmem>>, vector<2x1x128xbf16>
    tpu.vector_store %arg9[%c0_2, %c17, %c0_3], %0 {strides = array<i32>} : memref<2x18x128xbf16, #tpu.memory_space<vmem>>, vector<2x1x128xbf16>,
    %c0_4 = arith.constant 0 : index
    %c0_5 = arith.constant 0 : index
    %c0_6 = arith.constant 0 : index
    %3 = vector.load %arg0[%c0_4, %c0_5, %c0_6] : memref<2x16x128xf32, #tpu.memory_space<vmem>>, vector<2x16x128xf32>
    %4 = arith.truncf %3 : vector<2x16x128xf32> to vector<2x16x128xbf16>
    %c0_7 = arith.constant 0 : index
    %c1 = arith.constant 1 : index
    %c0_8 = arith.constant 0 : index
    %5 = vector.load %arg9[%c0_7, %c1, %c0_8] : memref<2x18x128xbf16, #tpu.memory_space<vmem>>, vector<2x16x128xbf16>
    tpu.vector_store %arg9[%c0_7, %c1, %c0_8], %4 {strides = array<i32>} : memref<2x18x128xbf16, #tpu.memory_space<vmem>>, vector<2x16x128xbf16>,
    %c0_9 = arith.constant 0 : index
    %c0_10 = arith.constant 0 : index
    %c0_11 = arith.constant 0 : index
    %6 = vector.load %arg9[%c0_9, %c0_10, %c0_11] : memref<2x18x128xbf16, #tpu.memory_space<vmem>>, vector<2x16x128xbf16>
    %7 = vector.shape_cast %6 : vector<2x16x128xbf16> to vector<32x128xbf16>
    %c0_12 = arith.constant 0 : index
    %c0_13 = arith.constant 0 : index
    %c0_14 = arith.constant 0 : index
    %8 = vector.load %arg1[%c0_12, %c0_13, %c0_14] : memref<3x128x128xbf16, #tpu.memory_space<vmem>>, vector<1x128x128xbf16>
    %9 = vector.shape_cast %8 : vector<1x128x128xbf16> to vector<128x128xbf16>
    %cst_15 = arith.constant dense<0.000000e+00> : vector<32x128xf32>
    %10 = tpu.matmul %7, %9, %cst_15 {dimension_numbers = #tpu.dot_dimension_numbers<[1], [0], [0], [1], [0, 0, 1, 1], [], []>} : vector<32x128xbf16>, vector<128x128xbf16>, vector<32x128xf32> -> vector<32x128xf32>
    %c0_16 = arith.constant 0 : index
    %c1_17 = arith.constant 1 : index
    %c0_18 = arith.constant 0 : index
    %11 = vector.load %arg9[%c0_16, %c1_17, %c0_18] : memref<2x18x128xbf16, #tpu.memory_space<vmem>>, vector<2x16x128xbf16>
    %12 = vector.shape_cast %11 : vector<2x16x128xbf16> to vector<32x128xbf16>
    %c1_19 = arith.constant 1 : index
    %c0_20 = arith.constant 0 : index
    %c0_21 = arith.constant 0 : index
    %13 = vector.load %arg1[%c1_19, %c0_20, %c0_21] : memref<3x128x128xbf16, #tpu.memory_space<vmem>>, vector<1x128x128xbf16>
    %14 = vector.shape_cast %13 : vector<1x128x128xbf16> to vector<128x128xbf16>
    %cst_22 = arith.constant dense<0.000000e+00> : vector<32x128xf32>
    %15 = tpu.matmul %12, %14, %cst_22 {dimension_numbers = #tpu.dot_dimension_numbers<[1], [0], [0], [1], [0, 0, 1, 1], [], []>} : vector<32x128xbf16>, vector<128x128xbf16>, vector<32x128xf32> -> vector<32x128xf32>
    %16 = arith.addf %10, %15 : vector<32x128xf32>
    %c0_23 = arith.constant 0 : index
    %c2 = arith.constant 2 : index
    %c0_24 = arith.constant 0 : index
    %17 = vector.load %arg9[%c0_23, %c2, %c0_24] : memref<2x18x128xbf16, #tpu.memory_space<vmem>>, vector<2x16x128xbf16>
    %18 = vector.shape_cast %17 : vector<2x16x128xbf16> to vector<32x128xbf16>
    %c2_25 = arith.constant 2 : index
    %c0_26 = arith.constant 0 : index
    %c0_27 = arith.constant 0 : index
    %19 = vector.load %arg1[%c2_25, %c0_26, %c0_27] : memref<3x128x128xbf16, #tpu.memory_space<vmem>>, vector<1x128x128xbf16>
    %20 = vector.shape_cast %19 : vector<1x128x128xbf16> to vector<128x128xbf16>
    %cst_28 = arith.constant dense<0.000000e+00> : vector<32x128xf32>
    %21 = tpu.matmul %18, %20, %cst_28 {dimension_numbers = #tpu.dot_dimension_numbers<[1], [0], [0], [1], [0, 0, 1, 1], [], []>} : vector<32x128xbf16>, vector<128x128xbf16>, vector<32x128xf32> -> vector<32x128xf32>
    %22 = arith.addf %16, %21 : vector<32x128xf32>
    %cst_29 = arith.constant dense<0.000000e+00> : vector<128xf32>
    %23 = vector.multi_reduction <add>, %22, %cst_29 [0] : vector<32x128xf32> to vector<128xf32>
    %24 = vector.shape_cast %23 : vector<128xf32> to vector<1x128xf32>
    %25 = arith.mulf %22, %22 : vector<32x128xf32>
    %cst_30 = arith.constant dense<0.000000e+00> : vector<128xf32>
    %26 = vector.multi_reduction <add>, %25, %cst_30 [0] : vector<32x128xf32> to vector<128xf32>
    %27 = vector.shape_cast %26 : vector<128xf32> to vector<1x128xf32>
    %c0_31 = arith.constant 0 : index
    %c0_32 = arith.constant 0 : index
    %28 = vector.load %arg3[%c0_31, %c0_32] : memref<128x128xf32, #tpu.memory_space<vmem>>, vector<128x128xf32>
    %cst_33 = arith.constant dense<0.000000e+00> : vector<1x128xf32>
    %29 = tpu.matmul %24, %28, %cst_33 {dimension_numbers = #tpu.dot_dimension_numbers<[1], [0], [0], [1], [0, 0, 1, 1], [], []>} : vector<1x128xf32>, vector<128x128xf32>, vector<1x128xf32> -> vector<1x128xf32>
    %c0_34 = arith.constant 0 : index
    %c0_35 = arith.constant 0 : index
    %30 = vector.load %arg3[%c0_34, %c0_35] : memref<128x128xf32, #tpu.memory_space<vmem>>, vector<128x128xf32>
    %cst_36 = arith.constant dense<0.000000e+00> : vector<1x128xf32>
    %31 = tpu.matmul %27, %30, %cst_36 {dimension_numbers = #tpu.dot_dimension_numbers<[1], [0], [0], [1], [0, 0, 1, 1], [], []>} : vector<1x128xf32>, vector<128x128xf32>, vector<1x128xf32> -> vector<1x128xf32>
    %32 = arith.mulf %29, %29 : vector<1x128xf32>
    %33 = arith.subf %31, %32 : vector<1x128xf32>
    %c0_37 = arith.constant 0 : index
    %c0_38 = arith.constant 0 : index
    %34 = vector.load %arg4[%c0_37, %c0_38] : memref<1x128xf32, #tpu.memory_space<vmem>>, vector<1x128xf32>
    %cst_39 = arith.constant 9.99999974E-6 : f32
    %35 = vector.broadcast %cst_39 : f32 to vector<1x128xf32>
    %36 = arith.addf %33, %35 : vector<1x128xf32>
    %37 = math.rsqrt %36 : vector<1x128xf32>
    %38 = arith.mulf %34, %37 : vector<1x128xf32>
    %c0_40 = arith.constant 0 : index
    %c0_41 = arith.constant 0 : index
    %39 = vector.load %arg5[%c0_40, %c0_41] : memref<1x128xf32, #tpu.memory_space<vmem>>, vector<1x128xf32>
    %40 = arith.mulf %29, %38 : vector<1x128xf32>
    %41 = arith.subf %39, %40 : vector<1x128xf32>
    %42 = vector.broadcast %38 : vector<1x128xf32> to vector<32x128xf32>
    %43 = arith.mulf %22, %42 : vector<32x128xf32>
    %44 = vector.broadcast %41 : vector<1x128xf32> to vector<32x128xf32>
    %45 = arith.addf %43, %44 : vector<32x128xf32>
    %cst_42 = arith.constant 0.000000e+00 : f32
    %46 = vector.broadcast %cst_42 : f32 to vector<32x128xf32>
    %47 = arith.maximumf %45, %46 : vector<32x128xf32>
    %48 = vector.shape_cast %47 : vector<32x128xf32> to vector<2x16x128xf32>
    %49 = arith.truncf %48 : vector<2x16x128xf32> to vector<2x16x128xbf16>
    %c0_43 = arith.constant 0 : index
    %c1_44 = arith.constant 1 : index
    %c0_45 = arith.constant 0 : index
    %50 = vector.load %arg9[%c0_43, %c1_44, %c0_45] : memref<2x18x128xbf16, #tpu.memory_space<vmem>>, vector<2x16x128xbf16>
    tpu.vector_store %arg9[%c0_43, %c1_44, %c0_45], %49 {strides = array<i32>} : memref<2x18x128xbf16, #tpu.memory_space<vmem>>, vector<2x16x128xbf16>,
    %c0_46 = arith.constant 0 : index
    %c0_47 = arith.constant 0 : index
    %c0_48 = arith.constant 0 : index
    %51 = vector.load %arg9[%c0_46, %c0_47, %c0_48] : memref<2x18x128xbf16, #tpu.memory_space<vmem>>, vector<2x16x128xbf16>
    %52 = vector.shape_cast %51 : vector<2x16x128xbf16> to vector<32x128xbf16>
    %c0_49 = arith.constant 0 : index
    %c0_50 = arith.constant 0 : index
    %c0_51 = arith.constant 0 : index
    %53 = vector.load %arg2[%c0_49, %c0_50, %c0_51] : memref<3x128x128xbf16, #tpu.memory_space<vmem>>, vector<1x128x128xbf16>
    %54 = vector.shape_cast %53 : vector<1x128x128xbf16> to vector<128x128xbf16>
    %cst_52 = arith.constant dense<0.000000e+00> : vector<32x128xf32>
    %55 = tpu.matmul %52, %54, %cst_52 {dimension_numbers = #tpu.dot_dimension_numbers<[1], [0], [0], [1], [0, 0, 1, 1], [], []>} : vector<32x128xbf16>, vector<128x128xbf16>, vector<32x128xf32> -> vector<32x128xf32>
    %c0_53 = arith.constant 0 : index
    %c1_54 = arith.constant 1 : index
    %c0_55 = arith.constant 0 : index
    %56 = vector.load %arg9[%c0_53, %c1_54, %c0_55] : memref<2x18x128xbf16, #tpu.memory_space<vmem>>, vector<2x16x128xbf16>
    %57 = vector.shape_cast %56 : vector<2x16x128xbf16> to vector<32x128xbf16>
    %c1_56 = arith.constant 1 : index
    %c0_57 = arith.constant 0 : index
    %c0_58 = arith.constant 0 : index
    %58 = vector.load %arg2[%c1_56, %c0_57, %c0_58] : memref<3x128x128xbf16, #tpu.memory_space<vmem>>, vector<1x128x128xbf16>
    %59 = vector.shape_cast %58 : vector<1x128x128xbf16> to vector<128x128xbf16>
    %cst_59 = arith.constant dense<0.000000e+00> : vector<32x128xf32>
    %60 = tpu.matmul %57, %59, %cst_59 {dimension_numbers = #tpu.dot_dimension_numbers<[1], [0], [0], [1], [0, 0, 1, 1], [], []>} : vector<32x128xbf16>, vector<128x128xbf16>, vector<32x128xf32> -> vector<32x128xf32>
    %61 = arith.addf %55, %60 : vector<32x128xf32>
    %c0_60 = arith.constant 0 : index
    %c2_61 = arith.constant 2 : index
    %c0_62 = arith.constant 0 : index
    %62 = vector.load %arg9[%c0_60, %c2_61, %c0_62] : memref<2x18x128xbf16, #tpu.memory_space<vmem>>, vector<2x16x128xbf16>
    %63 = vector.shape_cast %62 : vector<2x16x128xbf16> to vector<32x128xbf16>
    %c2_63 = arith.constant 2 : index
    %c0_64 = arith.constant 0 : index
    %c0_65 = arith.constant 0 : index
    %64 = vector.load %arg2[%c2_63, %c0_64, %c0_65] : memref<3x128x128xbf16, #tpu.memory_space<vmem>>, vector<1x128x128xbf16>
    %65 = vector.shape_cast %64 : vector<1x128x128xbf16> to vector<128x128xbf16>
    %cst_66 = arith.constant dense<0.000000e+00> : vector<32x128xf32>
    %66 = tpu.matmul %63, %65, %cst_66 {dimension_numbers = #tpu.dot_dimension_numbers<[1], [0], [0], [1], [0, 0, 1, 1], [], []>} : vector<32x128xbf16>, vector<128x128xbf16>, vector<32x128xf32> -> vector<32x128xf32>
    %67 = arith.addf %61, %66 : vector<32x128xf32>
    %cst_67 = arith.constant dense<0.000000e+00> : vector<128xf32>
    %68 = vector.multi_reduction <add>, %67, %cst_67 [0] : vector<32x128xf32> to vector<128xf32>
    %69 = vector.shape_cast %68 : vector<128xf32> to vector<1x128xf32>
    %70 = arith.mulf %67, %67 : vector<32x128xf32>
    %cst_68 = arith.constant dense<0.000000e+00> : vector<128xf32>
    %71 = vector.multi_reduction <add>, %70, %cst_68 [0] : vector<32x128xf32> to vector<128xf32>
    %72 = vector.shape_cast %71 : vector<128xf32> to vector<1x128xf32>
    %c0_69 = arith.constant 0 : index
    %c0_70 = arith.constant 0 : index
    %73 = vector.load %arg3[%c0_69, %c0_70] : memref<128x128xf32, #tpu.memory_space<vmem>>, vector<128x128xf32>
    %cst_71 = arith.constant dense<0.000000e+00> : vector<1x128xf32>
    %74 = tpu.matmul %69, %73, %cst_71 {dimension_numbers = #tpu.dot_dimension_numbers<[1], [0], [0], [1], [0, 0, 1, 1], [], []>} : vector<1x128xf32>, vector<128x128xf32>, vector<1x128xf32> -> vector<1x128xf32>
    %c0_72 = arith.constant 0 : index
    %c0_73 = arith.constant 0 : index
    %75 = vector.load %arg3[%c0_72, %c0_73] : memref<128x128xf32, #tpu.memory_space<vmem>>, vector<128x128xf32>
    %cst_74 = arith.constant dense<0.000000e+00> : vector<1x128xf32>
    %76 = tpu.matmul %72, %75, %cst_74 {dimension_numbers = #tpu.dot_dimension_numbers<[1], [0], [0], [1], [0, 0, 1, 1], [], []>} : vector<1x128xf32>, vector<128x128xf32>, vector<1x128xf32> -> vector<1x128xf32>
    %77 = arith.mulf %74, %74 : vector<1x128xf32>
    %78 = arith.subf %76, %77 : vector<1x128xf32>
    %c0_75 = arith.constant 0 : index
    %c0_76 = arith.constant 0 : index
    %79 = vector.load %arg6[%c0_75, %c0_76] : memref<1x128xf32, #tpu.memory_space<vmem>>, vector<1x128xf32>
    %cst_77 = arith.constant 9.99999974E-6 : f32
    %80 = vector.broadcast %cst_77 : f32 to vector<1x128xf32>
    %81 = arith.addf %78, %80 : vector<1x128xf32>
    %82 = math.rsqrt %81 : vector<1x128xf32>
    %83 = arith.mulf %79, %82 : vector<1x128xf32>
    %c0_78 = arith.constant 0 : index
    %c0_79 = arith.constant 0 : index
    %84 = vector.load %arg7[%c0_78, %c0_79] : memref<1x128xf32, #tpu.memory_space<vmem>>, vector<1x128xf32>
    %85 = arith.mulf %74, %83 : vector<1x128xf32>
    %86 = arith.subf %84, %85 : vector<1x128xf32>
    %87 = vector.broadcast %83 : vector<1x128xf32> to vector<32x128xf32>
    %88 = arith.mulf %67, %87 : vector<32x128xf32>
    %89 = vector.broadcast %86 : vector<1x128xf32> to vector<32x128xf32>
    %90 = arith.addf %88, %89 : vector<32x128xf32>
    %c0_80 = arith.constant 0 : index
    %c0_81 = arith.constant 0 : index
    %c0_82 = arith.constant 0 : index
    %91 = vector.load %arg0[%c0_80, %c0_81, %c0_82] : memref<2x16x128xf32, #tpu.memory_space<vmem>>, vector<2x16x128xf32>
    %92 = vector.shape_cast %91 : vector<2x16x128xf32> to vector<32x128xf32>
    %93 = arith.addf %90, %92 : vector<32x128xf32>
    %cst_83 = arith.constant 0.000000e+00 : f32
    %94 = vector.broadcast %cst_83 : f32 to vector<32x128xf32>
    %95 = arith.maximumf %93, %94 : vector<32x128xf32>
    %c0_84 = arith.constant 0 : index
    %c0_85 = arith.constant 0 : index
    %96 = vector.load %arg8[%c0_84, %c0_85] : memref<32x128xf32, #tpu.memory_space<vmem>>, vector<32x128xf32>
    tpu.vector_store %arg8[%c0_84, %c0_85], %95 {strides = array<i32>} : memref<32x128xf32, #tpu.memory_space<vmem>>, vector<32x128xf32>,
    return
  }
}

</mosaic_0001>

<bundles_post_ra>
// kernel: block_a_forward.1
= control target key start
LH: loop header
LB: loop body
LE: loop exit
PB: predicated region body
PF: predicated region fallthrough
CT: control target
= control target key end

     0   :  { %vm30_vm0 = vcmask 1040384   ;;  %vm31_vm1 = vsmask.f32 256  ;;  %v33_v8 = vld [vmem:[#allocation2] sm:$0x1]  ;;  %vm97_vm6 = vcmask 1043456   ;;  %s1976_s1 = inlined_call_operand.vmem [shape: bf16[3,128,128], index: 1, kind: input, shape index: {}]   ;;  %s1977_s0 = inlined_call_operand.vmem [shape: f32[2,16,128], index: 0, kind: input, shape index: {}]   ;;  %s1978_s3 = inlined_call_operand.vmem [shape: f32[128,128], index: 3, kind: input, shape index: {}]   ;;  %s1979_s2 = inlined_call_operand.vmem [shape: bf16[3,128,128], index: 2, kind: input, shape index: {}]   ;;  %s1980_s4 = inlined_call_operand.vmem [shape: f32[1,128], index: 4, kind: input, shape index: {}]   ;;  %s1981_s5 = inlined_call_operand.vmem [shape: f32[1,128], index: 5, kind: input, shape index: {}]   ;;  %s1982_s6 = inlined_call_operand.vmem [shape: f32[1,128], index: 6, kind: input, shape index: {}]   ;;  %s1983_s7 = inlined_call_operand.vmem [shape: f32[1,128], index: 7, kind: input, shape index: {}]   ;;  %s1984_s8 = inlined_call_operand.vmem [shape: f32[32,128], index: 8, kind: output, shape index: {}]  }
   0x1   :  { %v1427_v0 = vld [vmem:[%s1976_s1 + $0x78] sm:$0xff]  ;;  %v1426_v3 = vld [vmem:[%s1976_s1 + $0x70] sm:$0xff]  ;;  %v1425_v6 = vld [vmem:[%s1976_s1 + $0x68] sm:$0xff]  ;;  %vm39_vm2 = vsmask.f32 7938  ;;  %vm363_vm9 = vcmask 1042432  }
   0x2   :  { %v1419_v1 = vld [vmem:[%s1976_s1 + $0x38] sm:$0xff]  ;;  %259 = vmatpush.bf16.msra.mxu0 %v1427_v0  ;;  %v1418_v4 = vld [vmem:[%s1976_s1 + $0x30] sm:$0xff]  ;;  %v1417_v7 = vld [vmem:[%s1976_s1 + $0x28] sm:$0xff]  ;;  %vm55_vm5 = vsmask.f32 4368  ;;  %vm364_vm10 = vcmask 1046532  }
   0x3   :  { %v1435_v2 = vld [vmem:[%s1976_s1 + $0xb8] sm:$0xff]  ;;  %338 = vmatpush.bf16.msra.mxu1 %v1419_v1  ;;  %v1434_v5 = vld [vmem:[%s1976_s1 + $0xb0] sm:$0xff]  ;;  %v1433_v9 = vld [vmem:[%s1976_s1 + $0xa8] sm:$0xff]  ;;  %vm135_vm11 = vsmask.f32 3328 }
   0x4   :  { %453 = vmatpush.bf16.msra.mxu2 %v1435_v2  ;;  %v1424_v10 = vld [vmem:[%s1976_s1 + $0x60] sm:$0xff]  ;;  %vm1546_vm3 = vmand %vm30_vm0, %vm31_vm1  ;;  %v41_v13 = vld [vmem:[#allocation2 + $0x8] sm:$0x1]  ;;  %vm136_vm12 = vsmask.f32 7440 }
   0x5   :  { %v1416_v11 = vld [vmem:[%s1976_s1 + $0x20] sm:$0xff]  ;;  %v34_v16 = vsel %vm1546_vm3, 0, %v33_v8  ;;  %vm1560_vm4 = vmand %vm30_vm0, %vm39_vm2  ;;  %v48_v18 = vld [vmem:[%s1977_s0 + $0x8] sm:$0xff] }
   0x6   :  { %260 = vmatpush.bf16.msra.mxu0 %v1426_v3  ;;  %v47_v14 = vld [vmem:[%s1977_s0] sm:$0xff]  ;;  %v36_v20 = vld [vmem:[#allocation2 + $0xc] sm:$0x1]  ;;  %35 = vst [vmem:[#allocation2] sm:$0x1] %v34_v16  ;;  %v42_v21 = vsel %vm1560_vm4, 0, %v41_v13  ;;  %v52_v22 = vpack.c.bf16 %v48_v18, %v48_v18  ;;  %vm1587_vm7 = vmor %vm31_vm1, %vm55_vm5 }
   0x7   :  { %339 = vmatpush.bf16.msra.mxu1 %v1418_v4  ;;  %v1432_v15 = vld [vmem:[%s1976_s1 + $0xa0] sm:$0xff]  ;;  %v51_v19 = vpack.c.bf16 %v47_v14, %v47_v14  ;;  %v37_v23 = vsel %vm1546_vm3, 0, %v36_v20  ;;  %v44_v24 = vld [vmem:[#allocation2 + $0x14] sm:$0x1]  ;;  %43 = vst [vmem:[#allocation2 + $0x8] sm:$0x1] %v42_v21  ;;  %vm1596_vm8 = vmand %vm97_vm6, %vm39_vm2 }
   0x8   :  { %454 = vmatpush.bf16.msra.mxu2 %v1434_v5  ;;  %v45_v27 = vsel %vm1560_vm4, 0, %v44_v24  ;;  %v49_v28 = vld [vmem:[%s1977_s0 + $0x10] sm:$0xff]  ;;  %v66_v29 = vshrl.u32 %v52_v22, 16  ;;  %v69_v30 = vshll.u32 %v52_v22, 16  ;;  %38 = vst [vmem:[#allocation2 + $0xc] sm:$0x1] %v37_v23  ;;  %vm1645_vm13 = vmor %vm363_vm9, %vm364_vm10 }
   0x9   :  { %v58_v25 = vshrl.u32 %v51_v19, 16  ;;  %v61_v26 = vshll.u32 %v51_v19, 16  ;;  %v50_v31 = vld [vmem:[%s1977_s0 + $0x18] sm:$0xff]  ;;  %v53_v32 = vpack.c.bf16 %v49_v28, %v49_v28  ;;  %46 = vst [vmem:[#allocation2 + $0x14] sm:$0x1] %v45_v27  ;;  %v1422_v52 = vld [vmem:[%s1976_s1 + $0x50] sm:$0xff]  ;;  %vm1653_vm14 = vmor %vm135_vm11, %vm136_vm12 }
   0xa   :  { %261 = vmatpush.bf16.msra.mxu0 %v1425_v6  ;;  %v54_v34 = vpack.c.bf16 %v50_v31, %v50_v31  ;;  %v1423_v35 = vld [vmem:[%s1976_s1 + $0x58] sm:$0xff]  ;;  %v68_v38 = vrot.slane %v66_v29, 7  ;;  %v1414_v53 = vld [vmem:[%s1976_s1 + $0x10] sm:$0xff]  ;;  %v1421_v4 = vld [vmem:[%s1976_s1 + $0x48] sm:$0xff] }
   0xb   :  { %340 = vmatpush.bf16.msra.mxu1 %v1417_v7  ;;  %v60_v33 = vrot.slane %v58_v25, 7  ;;  %v1415_v36 = vld [vmem:[%s1976_s1 + $0x18] sm:$0xff]  ;;  %v75_v39 = vshrl.u32 %v53_v32, 16  ;;  %v78_v40 = vshll.u32 %v53_v32, 16  ;;  %v1430_v59 = vld [vmem:[%s1976_s1 + $0x90] sm:$0xff]  ;;  %v1413_v5 = vld [vmem:[%s1976_s1 + $0x8] sm:$0xff] }
   0xc   :  { %455 = vmatpush.bf16.msra.mxu2 %v1433_v9  ;;  %v1431_v41 = vld [vmem:[%s1976_s1 + $0x98] sm:$0xff]  ;;  %v83_v45 = vshrl.u32 %v54_v34, 16  ;;  %v86_v46 = vshll.u32 %v54_v34, 16  ;;  %v71_v47 = vor.u32 %v69_v30, %v68_v38  ;;  %v73_v48 = vrot.slane %v68_v38, 4  ;;  %v1429_v6 = vld [vmem:[%s1976_s1 + $0x88] sm:$0xff]  ;;  %v1420_v7 = vld [vmem:[%s1976_s1 + $0x40] sm:$0xff] }
   0xd   :  { %v63_v42 = vor.u32 %v61_v26, %v60_v33  ;;  %v64_v43 = vrot.slane %v60_v33, 4  ;;  %v77_v49 = vrot.slane %v75_v39, 7  ;;  %v99_v50 = vld [vmem:[#allocation2] sm:$0xf] }
   0xe   :  { %262 = vmatpush.bf16.msra.mxu0 %v1424_v10  ;;  %v85_v51 = vrot.slane %v83_v45, 7  ;;  %v103_v56 = vld [vmem:[#allocation2 + $0x8] sm:$0x1]  ;;  %v1412_v8 = vld [vmem:[%s1976_s1] sm:$0xff] }
   0xf   :  { %341 = vmatpush.bf16.msra.mxu1 %v1416_v11  ;;  %v72_v54 = vsel %vm1587_vm7, %v64_v43, %v71_v47  ;;  %v100_v55 = vsel %vm1596_vm8, %v63_v42, %v99_v50  ;;  %v80_v57 = vor.u32 %v78_v40, %v77_v49  ;;  %v81_v58 = vrot.slane %v77_v49, 4  ;;  %v106_v63 = vld [vmem:[#allocation2 + $0xc] sm:$0xf]  ;;  %v1428_v11 = vld [vmem:[%s1976_s1 + $0x80] sm:$0xff] }
  0x10   :  { %456 = vmatpush.bf16.msra.mxu2 %v1432_v15  ;;  %101 = vst [vmem:[#allocation2] sm:$0xf] %v100_v55  ;;  %v104_v60 = vsel %vm1546_vm3, %v73_v48, %v103_v56  ;;  %v88_v61 = vor.u32 %v86_v46, %v85_v51  ;;  %v90_v62 = vrot.slane %v85_v51, 4  ;;  %v110_v1 = vld [vmem:[#allocation2 + $0x14] sm:$0x1] }
  0x11   :  { %102 = vst [vmem:[#allocation2 + $0x4] sm:$0xf] %v72_v54  ;;  %v107_v0 = vsel %vm1596_vm8, %v80_v57, %v106_v63 }
  0x12   :  { %263 = vmatpush.bf16.msra.mxu0 %v1423_v35  ;;  %105 = vst [vmem:[#allocation2 + $0x8] sm:$0x1] %v104_v60  ;;  %v89_v2 = vsel %vm1587_vm7, %v81_v58, %v88_v61  ;;  %v111_v3 = vsel %vm1546_vm3, %v90_v62, %v110_v1 }
  0x13   :  { %342 = vmatpush.bf16.msra.mxu1 %v1415_v36  ;;  %108 = vst [vmem:[#allocation2 + $0xc] sm:$0xf] %v107_v0 }
  0x14   :  { %457 = vmatpush.bf16.msra.mxu2 %v1431_v41  ;;  %109 = vst [vmem:[#allocation2 + $0x10] sm:$0xf] %v89_v2 }
  0x15   :  { %112 = vst [vmem:[#allocation2 + $0x14] sm:$0x1] %v111_v3 }
  0x16   :  { %264 = vmatpush.bf16.msra.mxu0 %v1422_v52 }
  0x17   :  { %343 = vmatpush.bf16.msra.mxu1 %v1414_v53  ;;  %v1636_v9 = vld [vmem:[#allocation2] sm:$0xf] }
  0x18   :  { %458 = vmatpush.bf16.msra.mxu2 %v1430_v59  ;;  %v357_v10 = vld [vmem:[#allocation2] sm:$0xe]  ;;  %v114_v13 = vld [vmem:[#allocation2 + $0x4] sm:$0xf]  ;;  %v139_v14 = vshrl.u32 %v1636_v9, 16  ;;  %v142_v15 = vshll.u32 %v1636_v9, 16 }
  0x19   :  { %v1222_v17 = vrot.slane %v357_v10, 9  ;;  %v133_v18 = vld [vmem:[#allocation2 + $0x8] sm:$0x1]  ;;  %v148_v19 = vshll.u32 %v114_v13, 16  ;;  %v152_v20 = vshrl.u32 %v114_v13, 16  ;;  %v1410_v21 = vld [vmem:[#allocation2] sm:$0xff] }
  0x1a   :  { %265 = vmatpush.bf16.msra.mxu0 %v1421_v4  ;;  %v368_v22 = vrot.slane %v114_v13, 5  ;;  %v141_v23 = vrot.slane %v139_v14, 4  ;;  %v144_v24 = vrot.slane %v142_v15, 5  ;;  %v158_v25 = vshll.u32 %v133_v18, 16  ;;  %v115_v27 = vld [vmem:[#allocation2 + $0xc] sm:$0xf] }
  0x1b   :  { %344 = vmatpush.bf16.msra.mxu1 %v1413_v5  ;;  %v371_v26 = vrot.slane %v133_v18, 5  ;;  %v150_v28 = vrot.slane %v148_v19, 5  ;;  %v154_v29 = vrot.slane %v152_v20, 4  ;;  %v116_v32 = vld [vmem:[#allocation2 + $0x10] sm:$0xf]  ;;  %v163_v36 = vshrl.u32 %v115_v27, 16 }
  0x1c   :  { %459 = vmatpush.bf16.msra.mxu2 %v1429_v6  ;;  %v369_v30 = vsel %vm1645_vm13, %v1222_v17, %v368_v22  ;;  %v370_v31 = vrot.slane %v368_v22, 4  ;;  %v145_v33 = vor.u32 %v144_v24, %v141_v23  ;;  %v160_v34 = vrot.slane %v158_v25, 5  ;;  %v134_v48 = vld [vmem:[#allocation2 + $0x14] sm:$0x1]  ;;  %v358_v55 = vld [vmem:[#allocation2 + $0xc] sm:$0xe] }
  0x1d   :  { %v397_v35 = vunpack.c.l.b16 %v369_v30  ;;  %v155_v39 = vor.u32 %v154_v29, %v150_v28  ;;  %v166_v41 = vshll.u32 %v115_v27, 16  ;;  %v172_v42 = vshll.u32 %v116_v32, 16  ;;  %v1674_v20 = vld [vmem:[%s1978_s3 + $0x78] sm:$0xff]  ;;  %v1686_v22 = vld [vmem:[%s1978_s3 + $0x68] sm:$0xff]  ;;  %v1695_v23 = vld [vmem:[%s1978_s3 + $0x60] sm:$0xff] }
  0x1e   :  { %266 = vmatpush.bf16.msra.mxu0 %v1420_v7  ;;  %v372_v40 = vsel %vm1645_vm13, %v370_v31, %v371_v26  ;;  %v146_v43 = vrot.slane %v145_v33, 4  ;;  %v176_v46 = vshrl.u32 %v116_v32, 16  ;;  %v165_v49 = vrot.slane %v163_v36, 4  ;;  %514 = vmatpush.msra.mxu3 %v1674_v20  ;;  %v1702_v24 = vld [vmem:[%s1978_s3 + $0x58] sm:$0xff]  ;;  %v1709_v26 = vld [vmem:[%s1978_s3 + $0x50] sm:$0xff]  ;;  %v1714_v27 = vld [vmem:[%s1978_s3 + $0x48] sm:$0xff] }
  0x1f   :  { %345 = vmatpush.bf16.msra.mxu1 %v1412_v8  ;;  %v398_v45 = vunpack.c.l.b16 %v372_v40  ;;  %v156_v47 = vrot.slane %v155_v39, 4  ;;  %v168_v50 = vrot.slane %v166_v41, 5  ;;  %v174_v51 = vrot.slane %v172_v42, 5  ;;  %v1411_v8 = vld [vmem:[#allocation2 + $0xc] sm:$0xff]  ;;  %v1730_v29 = vld [vmem:[%s1978_s3 + $0x38] sm:$0xff] }
  0x20   :  { %460 = vmatpush.bf16.msra.mxu2 %v1428_v11  ;;  %v151_v52 = vsel %vm1653_vm14, %v146_v43, %v150_v28  ;;  %v178_v54 = vrot.slane %v176_v46, 4  ;;  %v182_v59 = vshll.u32 %v134_v48, 16  ;;  %v375_v60 = vrot.slane %v116_v32, 5  ;;  %v1723_v28 = vld [vmem:[%s1978_s3 + $0x40] sm:$0xff]  ;;  %v1737_v31 = vld [vmem:[%s1978_s3 + $0x30] sm:$0xff]  ;;  %v1742_v32 = vld [vmem:[%s1978_s3 + $0x28] sm:$0xff] }
  0x21   :  { %v401_v53 = vpack.c.b16 %v398_v45, %v397_v35  ;;  %v161_v56 = vsel %vm1653_vm14, %v156_v47, %v160_v34  ;;  %v203_v57 = vunpack.c.l.b16 %v151_v52  ;;  %v169_v61 = vor.u32 %v168_v50, %v165_v49  ;;  %v1749_v35 = vld [vmem:[%s1978_s3 + $0x20] sm:$0xff]  ;;  %v1756_v36 = vld [vmem:[%s1978_s3 + $0x18] sm:$0xff]  ;;  %v1763_v39 = vld [vmem:[%s1978_s3 + $0x10] sm:$0xff] }
  0x22   :  { %346 = vmatmul.bf16.vlgmr.msra.gmra.mxu1 %v1410_v21  ;;  %v204_v58 = vunpack.c.l.b16 %v161_v56  ;;  %v179_v62 = vor.u32 %v178_v54, %v174_v51  ;;  %v1223_v63 = vrot.slane %v358_v55, 9  ;;  %v378_v0 = vrot.slane %v134_v48, 5  ;;  %534 = vmatpush.msrb.mxu0 %v1674_v20  ;;  %v1681_v21 = vld [vmem:[%s1978_s3 + $0x70] sm:$0xff]  ;;  %v1770_v41 = vld [vmem:[%s1978_s3 + $0x8] sm:$0xff]  ;;  %v1777_v43 = vld [vmem:[%s1978_s3] sm:$0xff] }
  0x23   :  { %461 = vmatmul.bf16.vlgmr.msra.gmra.mxu2 %v401_v53  ;;  %v377_v2 = vrot.slane %v375_v60, 4  ;;  %v184_v3 = vrot.slane %v182_v59, 5  ;;  %v170_v4 = vrot.slane %v169_v61, 4  ;;  %515 = vmatpush.msra.mxu3 %v1681_v21 }
  0x24   :  { %v207_v1 = vpack.c.b16 %v204_v58, %v203_v57  ;;  %v180_v5 = vrot.slane %v179_v62, 4  ;;  %v376_v6 = vsel %vm1645_vm13, %v1223_v63, %v375_v60  ;;  %535 = vmatpush.msrb.mxu0 %v1681_v21 }
  0x25   :  { %v379_v7 = vsel %vm1645_vm13, %v377_v2, %v378_v0  ;;  %v399_v10 = vunpack.c.l.b16 %v376_v6  ;;  %v175_v13 = vsel %vm1653_vm14, %v170_v4, %v174_v51  ;;  %516 = vmatpush.msra.mxu3 %v1686_v22 }
  0x26   :  { %267 = vmatmul.bf16.vlgmr.msra.gmra.mxu0 %v207_v1  ;;  %v400_v11 = vunpack.c.l.b16 %v379_v7  ;;  %v185_v14 = vsel %vm1653_vm14, %v180_v5, %v184_v3  ;;  %v205_v15 = vunpack.c.l.b16 %v175_v13 }
  0x27   :  { %v206_v17 = vunpack.c.l.b16 %v185_v14  ;;  %536 = vmatpush.msrb.mxu0 %v1686_v22  ;;  %517 = vmatpush.msra.mxu3 %v1695_v23 }
  0x28   :  { %v402_v18 = vpack.c.b16 %v400_v11, %v399_v10 }
  0x29   :  { %v208_v19 = vpack.c.b16 %v206_v17, %v205_v15  ;;  %537 = vmatpush.msrb.mxu0 %v1695_v23  ;;  %518 = vmatpush.msra.mxu3 %v1702_v24 }
  0x2b   :  { %538 = vmatpush.msrb.mxu0 %v1702_v24  ;;  %519 = vmatpush.msra.mxu3 %v1709_v26 }
  0x2d   :  { %539 = vmatpush.msrb.mxu0 %v1709_v26  ;;  %520 = vmatpush.msra.mxu3 %v1714_v27 }
  0x2f   :  { %540 = vmatpush.msrb.mxu0 %v1714_v27  ;;  %521 = vmatpush.msra.mxu3 %v1723_v28 }
  0x31   :  { %541 = vmatpush.msrb.mxu0 %v1723_v28  ;;  %522 = vmatpush.msra.mxu3 %v1730_v29 }
  0x32   :  { %351 = vmatmul.bf16.gmra.mxu1 %v1411_v8 }
  0x33   :  { %466 = vmatmul.bf16.gmra.mxu2 %v402_v18  ;;  %542 = vmatpush.msrb.mxu0 %v1730_v29 }
  0x34   :  { %523 = vmatpush.msra.mxu3 %v1737_v31 }
  0x35   :  { %543 = vmatpush.msrb.mxu0 %v1737_v31 }
  0x36   :  { %272 = vmatmul.bf16.gmra.mxu0 %v208_v19  ;;  %524 = vmatpush.msra.mxu3 %v1742_v32 }
  0x37   :  { %544 = vmatpush.msrb.mxu0 %v1742_v32 }
  0x38   :  { %525 = vmatpush.msra.mxu3 %v1749_v35 }
  0x39   :  { %545 = vmatpush.msrb.mxu0 %v1749_v35 }
  0x3a   :  { %526 = vmatpush.msra.mxu3 %v1756_v36 }
  0x3b   :  { %546 = vmatpush.msrb.mxu0 %v1756_v36 }
  0x3c   :  { %527 = vmatpush.msra.mxu3 %v1763_v39 }
  0x3d   :  { %547 = vmatpush.msrb.mxu0 %v1763_v39 }
  0x3e   :  { %528 = vmatpush.msra.mxu3 %v1770_v41 }
  0x3f   :  { %548 = vmatpush.msrb.mxu0 %v1770_v41 }
  0x40   :  { %529 = vmatpush.msra.mxu3 %v1777_v43 }
  0x41   :  { %549 = vmatpush.msrb.mxu0 %v1777_v43 }
  0x43   :  { %1042 = vmatpush.msra.mxu0 %v1674_v20 }
  0x45   :  { %1043 = vmatpush.msra.mxu0 %v1681_v21 }
  0x47   :  { %1044 = vmatpush.msra.mxu0 %v1686_v22 }
  0x49   :  { %1045 = vmatpush.msra.mxu0 %v1695_v23 }
  0x4b   :  { %1046 = vmatpush.msra.mxu0 %v1702_v24 }
  0x4d   :  { %1047 = vmatpush.msra.mxu0 %v1709_v26 }
  0x4f   :  { %1048 = vmatpush.msra.mxu0 %v1714_v27 }
  0x51   :  { %1049 = vmatpush.msra.mxu0 %v1723_v28 }
  0x53   :  { %1050 = vmatpush.msra.mxu0 %v1730_v29 }
  0x55   :  { %1051 = vmatpush.msra.mxu0 %v1737_v31 }
  0x57   :  { %1052 = vmatpush.msra.mxu0 %v1742_v32 }
  0x59   :  { %1053 = vmatpush.msra.mxu0 %v1749_v35 }
  0x5b   :  { %1054 = vmatpush.msra.mxu0 %v1756_v36 }
  0x5d   :  { %1055 = vmatpush.msra.mxu0 %v1763_v39 }
  0x5f   :  { %1056 = vmatpush.msra.mxu0 %v1770_v41 }
  0x61   :  { %1057 = vmatpush.msra.mxu0 %v1777_v43 }
  0x9f   :  { %v347_v25 = vpop.f32.mrf.mxu1 }
  0xa3   :  { %v268_v30 = vpop.f32.mrf.mxu0 }
  0xa4   :  { %v348_v47 = vadd.f32 %v347_v25, %v268_v30  ;;  %v1445_v25 = vld [vmem:[%s1979_s2 + $0x38] sm:$0xff]  ;;  %v1444_v30 = vld [vmem:[%s1979_s2 + $0x30] sm:$0xff] }
  0xa5   :  { %869 = vmatpush.bf16.msrb.mxu2 %v1445_v25 }
  0xa6   :  { %v462_v33 = vpop.f32.mrf.mxu2 }
  0xa7   :  { %v349_v34 = vpop.f32.mrf.mxu1  ;;  %v1788_v52 = vadd.f32 %v462_v33, %v348_v47 }
  0xa9   :  { %v485_v57 = vmul.f32 %v1788_v52, %v1788_v52  ;;  %870 = vmatpush.bf16.msrb.mxu2 %v1444_v30  ;;  %v1447_v30 = vld [vmem:[%s1979_s2 + $0x48] sm:$0xff] }
  0xab   :  { %v270_v40 = vpop.f32.mrf.mxu0 }
  0xac   :  { %v350_v48 = vadd.f32 %v349_v34, %v270_v40 }
  0xae   :  { %v464_v42 = vpop.f32.mrf.mxu2 }
  0xaf   :  { %v352_v45 = vpop.f32.mrf.mxu1  ;;  %v1785_v51 = vadd.f32 %v464_v42, %v350_v48  ;;  %v1453_v48 = vld [vmem:[%s1979_s2 + $0x78] sm:$0xff] }
  0xb0   :  { %790 = vmatpush.bf16.msrb.mxu1 %v1453_v48 }
  0xb1   :  { %v486_v55 = vmul.f32 %v1785_v51, %v1785_v51  ;;  %v476_v58 = vadd.f32 %v1785_v51, %v1788_v52 }
  0xb3   :  { %v273_v46 = vpop.f32.mrf.mxu0  ;;  %v489_v62 = vadd.f32 %v486_v55, %v485_v57  ;;  %v1459_v55 = vld [vmem:[%s1979_s2 + $0xa8] sm:$0xff] }
  0xb4   :  { %v353_v49 = vadd.f32 %v352_v45, %v273_v46  ;;  %v1461_v45 = vld [vmem:[%s1979_s2 + $0xb8] sm:$0xff]  ;;  %v1443_v46 = vld [vmem:[%s1979_s2 + $0x28] sm:$0xff] }
  0xb5   :  { %981 = vmatpush.bf16.msrb.mxu3 %v1461_v45  ;;  %871 = vmatpush.bf16.msrb.mxu2 %v1443_v46 }
  0xb6   :  { %v467_v50 = vpop.f32.mrf.mxu2 }
  0xb7   :  { %v1790_v53 = vadd.f32 %v467_v50, %v353_v49  ;;  %v354_v54 = vpop.f32.mrf.mxu1  ;;  %v1460_v49 = vld [vmem:[%s1979_s2 + $0xb0] sm:$0xff]  ;;  %v1442_v50 = vld [vmem:[%s1979_s2 + $0x20] sm:$0xff] }
  0xb9   :  { %v487_v59 = vmul.f32 %v1790_v53, %v1790_v53  ;;  %v477_v63 = vadd.f32 %v476_v58, %v1790_v53  ;;  %982 = vmatpush.bf16.msrb.mxu3 %v1460_v49  ;;  %872 = vmatpush.bf16.msrb.mxu2 %v1442_v50 }
  0xbb   :  { %v275_v56 = vpop.f32.mrf.mxu0  ;;  %v490_v1 = vadd.f32 %v489_v62, %v487_v59  ;;  %v1451_v59 = vld [vmem:[%s1979_s2 + $0x68] sm:$0xff]  ;;  %v1440_v62 = vld [vmem:[%s1979_s2 + $0x10] sm:$0xff] }
  0xbc   :  { %v355_v60 = vadd.f32 %v354_v54, %v275_v56  ;;  %v1452_v54 = vld [vmem:[%s1979_s2 + $0x70] sm:$0xff]  ;;  %v1441_v56 = vld [vmem:[%s1979_s2 + $0x18] sm:$0xff] }
  0xbd   :  { %791 = vmatpush.bf16.msrb.mxu1 %v1452_v54  ;;  %983 = vmatpush.bf16.msrb.mxu3 %v1459_v55 }
  0xbe   :  { %v469_v61 = vpop.f32.mrf.mxu2  ;;  %873 = vmatpush.bf16.msrb.mxu2 %v1441_v56 }
  0xbf   :  { %v1804_v0 = vadd.f32 %v469_v61, %v355_v60  ;;  %v1458_v61 = vld [vmem:[%s1979_s2 + $0xa0] sm:$0xff] }
  0xc1   :  { %v478_v2 = vadd.f32 %v477_v63, %v1804_v0  ;;  %v488_v3 = vmul.f32 %v1804_v0, %v1804_v0  ;;  %792 = vmatpush.bf16.msrb.mxu1 %v1451_v59  ;;  %984 = vmatpush.bf16.msrb.mxu3 %v1458_v61 }
  0xc2   :  { %874 = vmatpush.bf16.msrb.mxu2 %v1440_v62 }
  0xc3   :  { %v479_v4 = vrot.slane %v478_v2, 4  ;;  %v491_v5 = vadd.f32 %v490_v1, %v488_v3  ;;  %v1450_v1 = vld [vmem:[%s1979_s2 + $0x60] sm:$0xff]  ;;  %v1439_v3 = vld [vmem:[%s1979_s2 + $0x8] sm:$0xff] }
  0xc5   :  { %v492_v6 = vrot.slane %v491_v5, 4  ;;  %v480_v7 = vadd.f32 %v479_v4, %v478_v2  ;;  %v1457_v2 = vld [vmem:[%s1979_s2 + $0x98] sm:$0xff]  ;;  %793 = vmatpush.bf16.msrb.mxu1 %v1450_v1 }
  0xc6   :  { %985 = vmatpush.bf16.msrb.mxu3 %v1457_v2  ;;  %875 = vmatpush.bf16.msrb.mxu2 %v1439_v3 }
  0xc7   :  { %v481_v8 = vrot.slane %v480_v7, 2  ;;  %v493_v10 = vadd.f32 %v492_v6, %v491_v5  ;;  %v1449_v5 = vld [vmem:[%s1979_s2 + $0x58] sm:$0xff]  ;;  %v556_v6 = vld [vmem:[%s1980_s4] sm:$0x1] }
  0xc9   :  { %v482_v11 = vadd.f32 %v481_v8, %v480_v7  ;;  %v494_v13 = vrot.slane %v493_v10, 2  ;;  %v1456_v8 = vld [vmem:[%s1979_s2 + $0x90] sm:$0xff]  ;;  %794 = vmatpush.bf16.msrb.mxu1 %v1449_v5 }
  0xca   :  { %986 = vmatpush.bf16.msrb.mxu3 %v1456_v8  ;;  %v637_v8 = vld [vmem:[#allocation2 + $0x8] sm:$0x1] }
  0xcb   :  { %v483_v14 = vrot.slane %v482_v11, 1  ;;  %v495_v15 = vadd.f32 %v494_v13, %v493_v10  ;;  %v1438_v10 = vld [vmem:[%s1979_s2] sm:$0xff] }
  0xcc   :  { %876 = vmatpush.bf16.msrb.mxu2 %v1438_v10 }
  0xcd   :  { %v484_v17 = vadd.f32 %v483_v14, %v482_v11  ;;  %v496_v18 = vrot.slane %v495_v15, 1  ;;  %v1448_v14 = vld [vmem:[%s1979_s2 + $0x50] sm:$0xff] }
  0xce   :  { %795 = vmatpush.bf16.msrb.mxu1 %v1448_v14 }
  0xcf   :  { %530 = vmatmul.f32.vlgmr.msra.gmra.mxu3 %v484_v17  ;;  %v497_v19 = vadd.f32 %v496_v18, %v495_v15  ;;  %v569_v15 = vld [vmem:[%s1981_s5] sm:$0x1]  ;;  %v1455_v17 = vld [vmem:[%s1979_s2 + $0x88] sm:$0xff] }
  0xd0   :  { %987 = vmatpush.bf16.msrb.mxu3 %v1455_v17 }
  0xd1   :  { %550 = vmatmul.f32.vlgmr.msrb.gmra.mxu0 %v497_v19 }
  0xd2   :  { %796 = vmatpush.bf16.msrb.mxu1 %v1447_v30  ;;  %v640_v30 = vld [vmem:[#allocation2 + $0xc] sm:$0xf] }
 0x14e   :  { %v551_v40 = vpop.f32.mrf.mxu0 }
 0x152   :  { %v531_v33 = vpop.f32.mrf.mxu3 }
 0x153   :  { %v554_v34 = vmul.f32 %v531_v33, %v531_v33 }
 0x155   :  { %v555_v42 = vsub.f32 %v551_v40, %v554_v34  ;;  %v1454_v40 = vld [vmem:[%s1979_s2 + $0x80] sm:$0xff] }
 0x156   :  { %988 = vmatpush.bf16.msrb.mxu3 %v1454_v40 }
 0x157   :  { %v557_v47 = vadd.f32 1e-05, %v555_v42 }
 0x159   :  { %1462 = vrsqrt.f32 %v557_v47  ;;  %vm564_vm0 = vweird.f32 %v557_v47 }
 0x15f   :  { %v1463_v57 = vpop.eup %1462 }
 0x160   :  { %v559_v58 = vmul.f32 %v1463_v57, %v557_v47  ;;  %vm565_vm15 = vweird.f32 %v1463_v57 }
 0x161   :  { %vm566_vm1 = vmor %vm564_vm0, %vm565_vm15 }
 0x162   :  { %v560_v60 = vmul.f32 %v1463_v57, %v559_v58 }
 0x164   :  { %v561_v63 = vmul.f32 0.5, %v560_v60 }
 0x166   :  { %v562_v4 = vsub.f32 1.5, %v561_v63 }
 0x168   :  { %v563_v7 = vmul.f32 %v1463_v57, %v562_v4 }
 0x16a   :  { %v567_v11 = vsel %vm566_vm1, %v1463_v57, %v563_v7 }
 0x16b   :  { %v568_v13 = vmul.f32 %v567_v11, %v556_v6 }
 0x16d   :  { %v570_v18 = vmul.f32 %v568_v13, %v531_v33  ;;  %v573_v19 = vperm.slane %v568_v13, 0 }
 0x16f   :  { %v571_v25 = vsub.f32 %v569_v15, %v570_v18  ;;  %v575_v34 = vmul.f32 %v573_v19, %v1788_v52  ;;  %v576_v42 = vmul.f32 %v573_v19, %v1785_v51  ;;  %v577_v45 = vmul.f32 %v573_v19, %v1790_v53  ;;  %v1446_v52 = vld [vmem:[%s1979_s2 + $0x40] sm:$0xff] }
 0x170   :  { %v578_v33 = vmul.f32 %v573_v19, %v1804_v0  ;;  %797 = vmatpush.bf16.msrb.mxu1 %v1446_v52 }
 0x171   :  { %v580_v46 = vperm.slane %v571_v25, 0 }
 0x173   :  { %v582_v47 = vadd.f32 %v580_v46, %v575_v34  ;;  %v583_v48 = vadd.f32 %v580_v46, %v576_v42  ;;  %v584_v49 = vadd.f32 %v580_v46, %v577_v45  ;;  %v585_v50 = vadd.f32 %v580_v46, %v578_v33 }
 0x174   :  { %1062 = vmatpush.msra.mxu1 %v1674_v20 }
 0x175   :  { %v586_v54 = vmax.f32 %v582_v47, 0.0  ;;  %v587_v55 = vmax.f32 %v583_v48, 0.0  ;;  %v588_v56 = vmax.f32 %v584_v49, 0.0  ;;  %v589_v57 = vmax.f32 %v585_v50, 0.0 }
 0x176   :  { %1063 = vmatpush.msra.mxu1 %v1681_v21  ;;  %v644_v21 = vld [vmem:[#allocation2 + $0x14] sm:$0x1] }
 0x177   :  { %v590_v51 = vpack.c.bf16 %v586_v54, %v586_v54  ;;  %v591_v58 = vpack.c.bf16 %v587_v55, %v587_v55  ;;  %v592_v53 = vpack.c.bf16 %v588_v56, %v588_v56  ;;  %v593_v59 = vpack.c.bf16 %v589_v57, %v589_v57 }
 0x178   :  { %1064 = vmatpush.msra.mxu1 %v1686_v22 }
 0x179   :  { %v595_v0 = vshrl.u32 %v590_v51, 16  ;;  %v603_v60 = vshrl.u32 %v591_v58, 16  ;;  %v612_v61 = vshrl.u32 %v592_v53, 16  ;;  %v620_v62 = vshrl.u32 %v593_v59, 16 }
 0x17a   :  { %v598_v1 = vshll.u32 %v590_v51, 16  ;;  %v606_v3 = vshll.u32 %v591_v58, 16  ;;  %v615_v5 = vshll.u32 %v592_v53, 16  ;;  %v623_v7 = vshll.u32 %v593_v59, 16  ;;  %1065 = vmatpush.msra.mxu1 %v1695_v23 }
 0x17b   :  { %v597_v63 = vrot.slane %v595_v0, 7  ;;  %v605_v2 = vrot.slane %v603_v60, 7  ;;  %v614_v4 = vrot.slane %v612_v61, 7  ;;  %v622_v6 = vrot.slane %v620_v62, 7 }
 0x17c   :  { %1066 = vmatpush.msra.mxu1 %v1702_v24 }
 0x17d   :  { %v600_v10 = vor.u32 %v598_v1, %v597_v63  ;;  %v601_v11 = vrot.slane %v597_v63, 4  ;;  %v608_v20 = vor.u32 %v606_v3, %v605_v2  ;;  %v610_v13 = vrot.slane %v605_v2, 4 }
 0x17e   :  { %v617_v14 = vor.u32 %v615_v5, %v614_v4  ;;  %v618_v15 = vrot.slane %v614_v4, 4  ;;  %v625_v17 = vor.u32 %v623_v7, %v622_v6  ;;  %v627_v18 = vrot.slane %v622_v6, 4  ;;  %1067 = vmatpush.msra.mxu1 %v1709_v26 }
 0x17f   :  { %v609_v19 = vsel %vm1587_vm7, %v601_v11, %v608_v20  ;;  %v634_v25 = vsel %vm1596_vm8, %v600_v10, %v1636_v9  ;;  %v638_v22 = vsel %vm1546_vm3, %v610_v13, %v637_v8 }
 0x180   :  { %v626_v34 = vsel %vm1587_vm7, %v618_v15, %v625_v17  ;;  %635 = vst [vmem:[#allocation2] sm:$0xf] %v634_v25  ;;  %v645_v23 = vsel %vm1546_vm3, %v627_v18, %v644_v21  ;;  %v641_v40 = vsel %vm1596_vm8, %v617_v14, %v640_v30  ;;  %1068 = vmatpush.msra.mxu1 %v1714_v27 }
 0x181   :  { %636 = vst [vmem:[#allocation2 + $0x4] sm:$0xf] %v609_v19 }
 0x182   :  { %639 = vst [vmem:[#allocation2 + $0x8] sm:$0x1] %v638_v22  ;;  %1069 = vmatpush.msra.mxu1 %v1723_v28 }
 0x183   :  { %643 = vst [vmem:[#allocation2 + $0x10] sm:$0xf] %v626_v34 }
 0x184   :  { %646 = vst [vmem:[#allocation2 + $0x14] sm:$0x1] %v645_v23  ;;  %1070 = vmatpush.msra.mxu1 %v1730_v29 }
 0x185   :  { %642 = vst [vmem:[#allocation2 + $0xc] sm:$0xf] %v641_v40 }
 0x186   :  { %1071 = vmatpush.msra.mxu1 %v1737_v31 }
 0x187   :  { %v888_v37 = vld [vmem:[#allocation2] sm:$0xe] }
 0x188   :  { %v647_v9 = vld [vmem:[#allocation2] sm:$0xf]  ;;  %v648_v42 = vld [vmem:[#allocation2 + $0x4] sm:$0xf]  ;;  %v1360_v45 = vrot.slane %v888_v37, 9  ;;  %1072 = vmatpush.msra.mxu1 %v1742_v32 }
 0x189   :  { %v1436_v24 = vld [vmem:[#allocation2] sm:$0xff]  ;;  %v670_v12 = vshrl.u32 %v647_v9, 16  ;;  %v673_v33 = vshll.u32 %v647_v9, 16  ;;  %v667_v44 = vld [vmem:[#allocation2 + $0x8] sm:$0x1]  ;;  %v896_v46 = vrot.slane %v648_v42, 5 }
 0x18a   :  { %v679_v47 = vshll.u32 %v648_v42, 16  ;;  %v683_v26 = vshrl.u32 %v648_v42, 16  ;;  %877 = vmatmul.bf16.vlgmr.msrb.gmra.mxu2 %v1436_v24  ;;  %v899_v48 = vrot.slane %v667_v44, 5  ;;  %v689_v50 = vshll.u32 %v667_v44, 16  ;;  %v650_v57 = vld [vmem:[#allocation2 + $0x10] sm:$0xf]  ;;  %1073 = vmatpush.msra.mxu1 %v1749_v35 }
 0x18b   :  { %v672_v49 = vrot.slane %v670_v12, 4  ;;  %v675_v27 = vrot.slane %v673_v33, 5  ;;  %v897_v28 = vsel %vm1645_vm13, %v1360_v45, %v896_v46  ;;  %v898_v52 = vrot.slane %v896_v46, 4  ;;  %v668_v11 = vld [vmem:[#allocation2 + $0x14] sm:$0x1] }
 0x18c   :  { %v681_v54 = vrot.slane %v679_v47, 5  ;;  %v685_v55 = vrot.slane %v683_v26, 4  ;;  %v649_v58 = vld [vmem:[#allocation2 + $0xc] sm:$0xf]  ;;  %v925_v53 = vunpack.c.l.b16 %v897_v28  ;;  %v691_v61 = vrot.slane %v689_v50, 5  ;;  %1074 = vmatpush.msra.mxu1 %v1756_v36 }
 0x18d   :  { %v676_v56 = vor.u32 %v675_v27, %v672_v49  ;;  %v900_v29 = vsel %vm1645_vm13, %v898_v52, %v899_v48  ;;  %v694_v60 = vshrl.u32 %v649_v58, 16  ;;  %v697_v62 = vshll.u32 %v649_v58, 16  ;;  %v889_v20 = vld [vmem:[#allocation2 + $0xc] sm:$0xe] }
 0x18e   :  { %v686_v51 = vor.u32 %v685_v55, %v681_v54  ;;  %v926_v59 = vunpack.c.l.b16 %v900_v29  ;;  %v703_v63 = vshll.u32 %v650_v57, 16  ;;  %v903_v4 = vrot.slane %v650_v57, 5  ;;  %1075 = vmatpush.msra.mxu1 %v1763_v39  ;;  %v1437_v19 = vld [vmem:[#allocation2 + $0xc] sm:$0xff] }
 0x18f   :  { %v677_v0 = vrot.slane %v676_v56, 4  ;;  %v696_v5 = vrot.slane %v694_v60, 4  ;;  %v699_v7 = vrot.slane %v697_v62, 5  ;;  %v707_v8 = vshrl.u32 %v650_v57, 16 }
 0x190   :  { %v687_v31 = vrot.slane %v686_v51, 4  ;;  %v929_v1 = vpack.c.b16 %v926_v59, %v925_v53  ;;  %v705_v35 = vrot.slane %v703_v63, 5  ;;  %1076 = vmatpush.msra.mxu1 %v1770_v41  ;;  %v905_v36 = vrot.slane %v903_v4, 4 }
 0x191   :  { %v682_v2 = vsel %vm1653_vm14, %v677_v0, %v681_v54  ;;  %v709_v13 = vrot.slane %v707_v8, 4  ;;  %v700_v14 = vor.u32 %v699_v7, %v696_v5  ;;  %v1361_v17 = vrot.slane %v889_v20, 9 }
 0x192   :  { %v692_v32 = vsel %vm1653_vm14, %v687_v31, %v691_v61  ;;  %v734_v3 = vunpack.c.l.b16 %v682_v2  ;;  %989 = vmatmul.bf16.vlgmr.msrb.gmra.mxu3 %v929_v1  ;;  %v906_v18 = vrot.slane %v668_v11, 5  ;;  %v713_v21 = vshll.u32 %v668_v11, 16  ;;  %1077 = vmatpush.msra.mxu1 %v1777_v43 }
 0x193   :  { %v735_v6 = vunpack.c.l.b16 %v692_v32  ;;  %v710_v15 = vor.u32 %v709_v13, %v705_v35  ;;  %v701_v39 = vrot.slane %v700_v14, 4  ;;  %v904_v30 = vsel %vm1645_vm13, %v1361_v17, %v903_v4 }
 0x194   :  { %v907_v25 = vsel %vm1645_vm13, %v905_v36, %v906_v18  ;;  %v715_v41 = vrot.slane %v713_v21, 5  ;;  %v927_v37 = vunpack.c.l.b16 %v904_v30 }
 0x195   :  { %v738_v10 = vpack.c.b16 %v735_v6, %v734_v3  ;;  %v711_v22 = vrot.slane %v710_v15, 4  ;;  %v928_v34 = vunpack.c.l.b16 %v907_v25  ;;  %v706_v23 = vsel %vm1653_vm14, %v701_v39, %v705_v35  ;;  %v1084_v39 = vld [vmem:[%s1982_s6] sm:$0x1] }
 0x196   :  { %v736_v9 = vunpack.c.l.b16 %v706_v23 }
 0x197   :  { %798 = vmatmul.bf16.vlgmr.msrb.gmra.mxu1 %v738_v10  ;;  %v716_v40 = vsel %vm1653_vm14, %v711_v22, %v715_v41  ;;  %v930_v43 = vpack.c.b16 %v928_v34, %v927_v37  ;;  %v1097_v34 = vld [vmem:[%s1983_s7] sm:$0x1] }
 0x198   :  { %v737_v24 = vunpack.c.l.b16 %v716_v40 }
 0x19a   :  { %882 = vmatmul.bf16.gmra.mxu2 %v1437_v19  ;;  %v739_v42 = vpack.c.b16 %v737_v24, %v736_v9 }
 0x1a2   :  { %994 = vmatmul.bf16.gmra.mxu3 %v930_v43 }
 0x1a7   :  { %803 = vmatmul.bf16.gmra.mxu1 %v739_v42 }
 0x20d   :  { %v878_v45 = vpop.f32.mrf.mxu2 }
 0x214   :  { %v799_v12 = vpop.f32.mrf.mxu1 }
 0x215   :  { %v990_v33 = vpop.f32.mrf.mxu3  ;;  %v880_v16 = vpop.f32.mrf.mxu2  ;;  %v879_v49 = vadd.f32 %v878_v45, %v799_v12  ;;  %v1114_v12 = vld [vmem:[%s1977_s0] sm:$0xff] }
 0x217   :  { %v1000_v28 = vadd.f32 %v990_v33, %v879_v49  ;;  %v1115_v33 = vld [vmem:[%s1977_s0 + $0x8] sm:$0xff] }
 0x219   :  { %v1013_v57 = vmul.f32 %v1000_v28, %v1000_v28 }
 0x21c   :  { %v801_v44 = vpop.f32.mrf.mxu1 }
 0x21d   :  { %v992_v46 = vpop.f32.mrf.mxu3  ;;  %v883_v47 = vpop.f32.mrf.mxu2  ;;  %v881_v26 = vadd.f32 %v880_v16, %v801_v44  ;;  %v1116_v16 = vld [vmem:[%s1977_s0 + $0x10] sm:$0xff]  ;;  %v1117_v44 = vld [vmem:[%s1977_s0 + $0x18] sm:$0xff] }
 0x21f   :  { %v1001_v50 = vadd.f32 %v992_v46, %v881_v26 }
 0x221   :  { %v1014_v54 = vmul.f32 %v1001_v50, %v1001_v50  ;;  %v1004_v29 = vadd.f32 %v1001_v50, %v1000_v28 }
 0x223   :  { %v1017_v59 = vadd.f32 %v1014_v54, %v1013_v57 }
 0x224   :  { %v804_v48 = vpop.f32.mrf.mxu1 }
 0x225   :  { %v884_v27 = vadd.f32 %v883_v47, %v804_v48  ;;  %v995_v38 = vpop.f32.mrf.mxu3  ;;  %v885_v55 = vpop.f32.mrf.mxu2 }
 0x227   :  { %v1002_v52 = vadd.f32 %v995_v38, %v884_v27 }
 0x229   :  { %v1015_v51 = vmul.f32 %v1002_v52, %v1002_v52  ;;  %v1005_v0 = vadd.f32 %v1004_v29, %v1002_v52 }
 0x22b   :  { %v1018_v31 = vadd.f32 %v1017_v59, %v1015_v51 }
 0x22c   :  { %v806_v56 = vpop.f32.mrf.mxu1 }
 0x22d   :  { %v886_v58 = vadd.f32 %v885_v55, %v806_v56  ;;  %v997_v53 = vpop.f32.mrf.mxu3 }
 0x22f   :  { %v1003_v60 = vadd.f32 %v997_v53, %v886_v58 }
 0x231   :  { %v1006_v61 = vadd.f32 %v1005_v0, %v1003_v60  ;;  %v1016_v62 = vmul.f32 %v1003_v60, %v1003_v60 }
 0x233   :  { %v1007_v63 = vrot.slane %v1006_v61, 4  ;;  %v1019_v1 = vadd.f32 %v1018_v31, %v1016_v62 }
 0x235   :  { %v1008_v2 = vadd.f32 %v1007_v63, %v1006_v61  ;;  %v1020_v32 = vrot.slane %v1019_v1, 4 }
 0x237   :  { %v1009_v3 = vrot.slane %v1008_v2, 2  ;;  %v1021_v4 = vadd.f32 %v1020_v32, %v1019_v1 }
 0x239   :  { %v1010_v5 = vadd.f32 %v1009_v3, %v1008_v2  ;;  %v1022_v6 = vrot.slane %v1021_v4, 2 }
 0x23b   :  { %v1011_v7 = vrot.slane %v1010_v5, 1  ;;  %v1023_v35 = vadd.f32 %v1022_v6, %v1021_v4 }
 0x23d   :  { %v1012_v8 = vadd.f32 %v1011_v7, %v1010_v5  ;;  %v1024_v10 = vrot.slane %v1023_v35, 1 }
 0x23f   :  { %1058 = vmatmul.f32.vlgmr.msra.gmra.mxu0 %v1012_v8  ;;  %v1025_v11 = vadd.f32 %v1024_v10, %v1023_v35 }
 0x241   :  { %1078 = vmatmul.f32.vlgmr.msra.gmra.mxu1 %v1025_v11 }
 0x2bc   :  { %v1059_v20 = vpop.f32.mrf.mxu0 }
 0x2bd   :  { %v1082_v13 = vmul.f32 %v1059_v20, %v1059_v20 }
 0x2be   :  { %v1079_v36 = vpop.f32.mrf.mxu1 }
 0x2bf   :  { %v1083_v14 = vsub.f32 %v1079_v36, %v1082_v13 }
 0x2c1   :  { %v1085_v15 = vadd.f32 1e-05, %v1083_v14 }
 0x2c3   :  { %1464 = vrsqrt.f32 %v1085_v15  ;;  %vm1092_vm3 = vweird.f32 %v1085_v15 }
 0x2c9   :  { %v1465_v17 = vpop.eup %1464 }
 0x2ca   :  { %v1087_v18 = vmul.f32 %v1465_v17, %v1085_v15  ;;  %vm1093_vm2 = vweird.f32 %v1465_v17 }
 0x2cb   :  { %vm1094_vm4 = vmor %vm1092_vm3, %vm1093_vm2 }
 0x2cc   :  { %v1088_v21 = vmul.f32 %v1465_v17, %v1087_v18 }
 0x2ce   :  { %v1089_v19 = vmul.f32 0.5, %v1088_v21 }
 0x2d0   :  { %v1090_v25 = vsub.f32 1.5, %v1089_v19 }
 0x2d2   :  { %v1091_v22 = vmul.f32 %v1465_v17, %v1090_v25 }
 0x2d4   :  { %v1095_v30 = vsel %vm1094_vm4, %v1465_v17, %v1091_v22 }
 0x2d5   :  { %v1096_v41 = vmul.f32 %v1095_v30, %v1084_v39 }
 0x2d7   :  { %v1098_v23 = vmul.f32 %v1096_v41, %v1059_v20  ;;  %v1101_v40 = vperm.slane %v1096_v41, 0 }
 0x2d9   :  { %v1099_v37 = vsub.f32 %v1097_v34, %v1098_v23  ;;  %v1103_v43 = vmul.f32 %v1101_v40, %v1000_v28  ;;  %v1104_v9 = vmul.f32 %v1101_v40, %v1001_v50  ;;  %v1105_v24 = vmul.f32 %v1101_v40, %v1002_v52 }
 0x2da   :  { %v1106_v42 = vmul.f32 %v1101_v40, %v1003_v60 }
 0x2db   :  { %v1108_v45 = vperm.slane %v1099_v37, 0 }
 0x2dd   :  { %v1110_v46 = vadd.f32 %v1108_v45, %v1103_v43  ;;  %v1111_v47 = vadd.f32 %v1108_v45, %v1104_v9  ;;  %v1112_v26 = vadd.f32 %v1108_v45, %v1105_v24  ;;  %v1113_v48 = vadd.f32 %v1108_v45, %v1106_v42 }
 0x2df   :  { %v1118_v49 = vadd.f32 %v1114_v12, %v1110_v46  ;;  %v1119_v27 = vadd.f32 %v1115_v33, %v1111_v47  ;;  %v1120_v38 = vadd.f32 %v1116_v16, %v1112_v26  ;;  %v1121_v50 = vadd.f32 %v1117_v44, %v1113_v48 }
 0x2e1   :  { %v1122_v28 = vmax.f32 %v1118_v49, 0.0  ;;  %v1123_v52 = vmax.f32 %v1119_v27, 0.0  ;;  %v1124_v54 = vmax.f32 %v1120_v38, 0.0  ;;  %v1125_v55 = vmax.f32 %v1121_v50, 0.0 }
 0x2e3   :  { %1126 = vst [vmem:[%s1984_s8] sm:$0xff] %v1122_v28 }
 0x2e4   :  { %1127 = vst [vmem:[%s1984_s8 + $0x8] sm:$0xff] %v1123_v52 }
 0x2e5   :  { %1128 = vst [vmem:[%s1984_s8 + $0x10] sm:$0xff] %v1124_v54 }
 0x2e6   :  { %1129 = vst [vmem:[%s1984_s8 + $0x18] sm:$0xff] %v1125_v55 }

</bundles_post_ra>
